<compile_context>
chip_gen: v6e
topology: v6e:2x2x1
jax: 0.10.0
libtpu: 0.0.40
codegen_flags: <defaults>
</compile_context>

<pallas_src>
import functools

import jax
import jax.numpy as jnp
import numpy as np
from jax.experimental import pallas as pl
from jax.experimental.pallas import tpu as pltpu


def _round_up(x: int, m: int) -> int:
    return ((x + m - 1) // m) * m


@functools.lru_cache(maxsize=1)
def _tpu_profile():
    """Returns (num_tensorcores, (tm, tn, tk) defaults, vmem_limit_bytes)."""
    kind = ""
    try:
        kind = jax.devices()[0].device_kind.lower()
    except Exception:
        pass

    vmem_cap = 128 << 20
    try:
        info = pltpu.get_tpu_info()
        cap = getattr(info, "vmem_capacity_bytes", None)
        if cap:
            vmem_cap = int(cap)
    except Exception:
        pass

    if "v7" in kind or vmem_cap <= (64 << 20):
        # v7x: 3.2 TB/s HBM per TC, only 64 MiB VMEM, 2 TensorCores.
        vmem_cap = min(vmem_cap, 64 << 20)
        cores = 2
        tiles = (512, 1024, 512)
    elif "v6" in kind:
        # v6e: 918 TF/s bf16 vs ~1.4 TB/s HBM -> needs big M/N tiles to be MXU-bound.
        cores = 1
        tiles = (1024, 2048, 512)
    else:
        # v5e (and unknown chips): 197 TF/s bf16, moderate tiles already suffice.
        cores = 1
        tiles = (512, 512, 512)

    # Never request the whole physical VMEM; leave headroom for compiler scratch.
    vmem_limit = min(64 << 20, max(32 << 20, vmem_cap - (16 << 20)))
    return cores, tiles, vmem_limit


def _thresholded_linear_kernel(x_ref, w_ref, b_ref, o_ref):
    k = pl.program_id(2)

    # Output block is resident across the K axis -> accumulate directly into it.
    @pl.when(k == 0)
    def _():
        o_ref[...] = jnp.zeros_like(o_ref)

    o_ref[...] += jnp.dot(
        x_ref[...], w_ref[...], preferred_element_type=jnp.float32
    )

    # Epilogue: bias + ReLU applied exactly once per output tile.
    @pl.when(k == pl.num_programs(2) - 1)
    def _():
        o_ref[...] = jnp.maximum(o_ref[...] + b_ref[...], 0.0)


@functools.partial(
    jax.jit,
    static_argnames=("tm", "tn", "tk", "compute_dtype", "vmem_limit_bytes"),
)
def _thresholded_linear_impl(x, w, b, *, tm, tn, tk, compute_dtype, vmem_limit_bytes):
    B, Din = x.shape
    Dout = w.shape[1]

    Bp = _round_up(B, tm)
    Dinp = _round_up(Din, tk)
    Doutp = _round_up(Dout, tn)

    xc = x.astype(compute_dtype)
    wc = w.astype(compute_dtype)
    bc = b.astype(jnp.float32).reshape(1, Dout)

    # Pad only when actually unaligned; aligned problems pay zero extra HBM copies.
    # (K padding with zeros is required for correct accumulation; M/N padding is
    # sliced off after the call.)
    if (Bp, Dinp) != (B, Din):
        xc = jnp.pad(xc, ((0, Bp - B), (0, Dinp - Din)))
    if (Dinp, Doutp) != (Din, Dout):
        wc = jnp.pad(wc, ((0, Dinp - Din), (0, Doutp - Dout)))
    if Doutp != Dout:
        bc = jnp.pad(bc, ((0, 0), (0, Doutp - Dout)))

    grid_m, grid_n, grid_k = Bp // tm, Doutp // tn, Dinp // tk

    itemsize = np.dtype(compute_dtype).itemsize
    flops = 2 * B * Din * Dout
    bytes_accessed = (
        Bp * Dinp * itemsize * grid_n       # x re-streamed once per N block
        + Dinp * Doutp * itemsize * grid_m  # W re-streamed once per M block
        + Doutp * 4 * grid_m                # bias
        + Bp * Doutp * 4                    # output written once
    )

    out_padded = pl.pallas_call(
        _thresholded_linear_kernel,
        out_shape=jax.ShapeDtypeStruct((Bp, Doutp), jnp.float32),
        grid_spec=pltpu.PrefetchScalarGridSpec(
            num_scalar_prefetch=0,
            grid=(grid_m, grid_n, grid_k),
            in_specs=[
                pl.BlockSpec((tm, tk), lambda i, j, k: (i, k)),   # x tile
                pl.BlockSpec((tk, tn), lambda i, j, k: (k, j)),   # W tile
                pl.BlockSpec((1, tn), lambda i, j, k: (0, j)),    # bias tile
            ],
            out_specs=pl.BlockSpec((tm, tn), lambda i, j, k: (i, j)),
        ),
        compiler_params=pltpu.CompilerParams(
            dimension_semantics=("parallel", "parallel", "arbitrary"),
            vmem_limit_bytes=vmem_limit_bytes,
        ),
        cost_estimate=pl.CostEstimate(
            flops=flops, transcendentals=0, bytes_accessed=bytes_accessed
        ),
    )(xc, wc, bc)

    if (Bp, Doutp) != (B, Dout):
        return out_padded[:B, :Dout]
    return out_padded


def thresholded_linear(x, w, b, *, tm=None, tn=None, tk=None,
                       compute_dtype=jnp.bfloat16):
    """relu(x @ w + b).  x: [B, Din], w: [Din, Dout], b: [Dout] -> [B, Dout] (f32)."""
    B, Din = x.shape
    Dout = w.shape[1]

    cores, (dtm, dtn, dtk), vmem_limit = _tpu_profile()
    tm = dtm if tm is None else tm
    tn = dtn if tn is None else tn
    tk = dtk if tk is None else tk

    # Clamp tiles for small problems while keeping TPU tiling alignment:
    # M tile multiple of 8 (sublanes), N/K tiles multiples of 128 (lanes).
    tm = min(tm, _round_up(B, 8))
    tn = min(tn, _round_up(Dout, 128))
    tk = min(tk, _round_up(Din, 128))

    # Multi-TC chips (v7x): if the M axis has a single block, split N so both
    # "parallel" grid axes aren't degenerate (otherwise one TensorCore idles).
    if cores > 1 and pl.cdiv(B, tm) == 1:
        while pl.cdiv(_round_up(Dout, 128), tn) < 2 and tn > 128:
            tn = _round_up(tn // 2, 128)

    return _thresholded_linear_impl(
        x, w, b,
        tm=tm, tn=tn, tk=tk,
        compute_dtype=compute_dtype,
        vmem_limit_bytes=vmem_limit,
    )


if __name__ == "__main__":
    key = jax.random.PRNGKey(0)
    k_x, k_w, k_b = jax.random.split(key, 3)

    batch, in_dim, out_dim = 8, 32, 16

    # Deterministic params mimicking torch.nn.Linear init: U(-1/sqrt(in), 1/sqrt(in)).
    bound = 1.0 / (in_dim ** 0.5)
    w = jax.random.uniform(k_w, (in_dim, out_dim), jnp.float32, -bound, bound)
    b = jax.random.uniform(k_b, (out_dim,), jnp.float32, -bound, bound)
    x = jax.random.normal(k_x, (batch, in_dim), jnp.float32)

    # Default (bf16-MXU) path.
    out = jax.block_until_ready(thresholded_linear(x, w, b))
    assert out.shape == (batch, out_dim)

    ref_bf16 = jnp.maximum(
        jnp.dot(x.astype(jnp.bfloat16), w.astype(jnp.bfloat16),
                preferred_element_type=jnp.float32) + b[None, :], 0.0)
    ref_f32 = jnp.maximum(x @ w + b[None, :], 0.0)
    assert jnp.allclose(out, ref_bf16, atol=2e-3, rtol=2e-3)
    assert jnp.allclose(out, ref_f32, atol=3e-2, rtol=3e-2)

    # Exact f32 path (compute_dtype=f32) against the f32 reference.
    out_f32 = jax.block_until_ready(
        thresholded_linear(x, w, b, compute_dtype=jnp.float32))
    assert jnp.allclose(out_f32, ref_f32, atol=1e-4, rtol=1e-4)

    # Multi-tile configuration (forces grid > 1 on every axis, unaligned shapes).
    k2 = jax.random.PRNGKey(1)
    k_x2, k_w2, k_b2 = jax.random.split(k2, 3)
    B2, Din2, Dout2 = 192, 384, 272  # deliberately non-aligned shapes
    x2 = jax.random.normal(k_x2, (B2, Din2), jnp.float32)
    w2 = jax.random.normal(k_w2, (Din2, Dout2), jnp.float32) * 0.05
    b2 = jax.random.normal(k_b2, (Dout2,), jnp.float32)

    out2 = jax.block_until_ready(
        thresholded_linear(x2, w2, b2, tm=128, tn=128, tk=128))
    ref2_bf16 = jnp.maximum(
        jnp.dot(x2.astype(jnp.bfloat16), w2.astype(jnp.bfloat16),
                preferred_element_type=jnp.float32) + b2[None, :], 0.0)
    ref2_f32 = jnp.maximum(x2 @ w2 + b2[None, :], 0.0)
    assert out2.shape == (B2, Dout2)
    assert jnp.allclose(out2, ref2_bf16, atol=2e-3, rtol=2e-3)
    assert jnp.allclose(out2, ref2_f32, atol=5e-2, rtol=5e-2)

    print("KERNEL_OK")
</pallas_src>

<mosaic_0001>
module attributes {stable_mosaic.version = 11 : i64} {
  func.func @_thresholded_linear_kernel(%arg0: i32, %arg1: i32, %arg2: i32, %arg3: memref<8x128xbf16, #tpu.memory_space<vmem>>, %arg4: memref<128x128xbf16, #tpu.memory_space<vmem>>, %arg5: memref<1x128xf32, #tpu.memory_space<vmem>>, %arg6: memref<8x128xf32, #tpu.memory_space<vmem>>) attributes {dimension_semantics = [#tpu.dimension_semantics<parallel>, #tpu.dimension_semantics<parallel>, #tpu.dimension_semantics<arbitrary>], iteration_bounds = array<i64: 1, 1, 1>, scalar_prefetch = 0 : i64, scratch_operands = 0 : i64, tpu.core_type = #tpu.core_type<tc>, window_params = [{transform_indices = @transform_0, window_bounds = array<i64: 8, 128>}, {transform_indices = @transform_1, window_bounds = array<i64: 128, 128>}, {transform_indices = @transform_2, window_bounds = array<i64: 1, 128>}, {transform_indices = @transform_3, window_bounds = array<i64: 8, 128>}]} {
    %c0_i32 = arith.constant 0 : i32
    %0 = arith.cmpi eq, %arg2, %c0_i32 : i32
    %1 = arith.extui %0 : i1 to i32
    %c0_i32_0 = arith.constant 0 : i32
    %2 = arith.cmpi ne, %1, %c0_i32_0 : i32
    scf.if %2 {
      %cst_10 = arith.constant 0.000000e+00 : f32
      %12 = vector.broadcast %cst_10 : f32 to vector<8x128xf32>
      %c0_11 = arith.constant 0 : index
      %c0_12 = arith.constant 0 : index
      %13 = vector.load %arg6[%c0_11, %c0_12] : memref<8x128xf32, #tpu.memory_space<vmem>>, vector<8x128xf32>
      tpu.vector_store %arg6[%c0_11, %c0_12], %12 {strides = array<i32>} : memref<8x128xf32, #tpu.memory_space<vmem>>, vector<8x128xf32>,
    } else {
    }
    %c0 = arith.constant 0 : index
    %c0_1 = arith.constant 0 : index
    %3 = vector.load %arg6[%c0, %c0_1] : memref<8x128xf32, #tpu.memory_space<vmem>>, vector<8x128xf32>
    %c0_2 = arith.constant 0 : index
    %c0_3 = arith.constant 0 : index
    %4 = vector.load %arg3[%c0_2, %c0_3] : memref<8x128xbf16, #tpu.memory_space<vmem>>, vector<8x128xbf16>
    %c0_4 = arith.constant 0 : index
    %c0_5 = arith.constant 0 : index
    %5 = vector.load %arg4[%c0_4, %c0_5] : memref<128x128xbf16, #tpu.memory_space<vmem>>, vector<128x128xbf16>
    %cst = arith.constant dense<0.000000e+00> : vector<8x128xf32>
    %6 = tpu.matmul %4, %5, %cst {dimension_numbers = #tpu.dot_dimension_numbers<[1], [0], [0], [1], [0, 0, 1, 1], [], []>} : vector<8x128xbf16>, vector<128x128xbf16>, vector<8x128xf32> -> vector<8x128xf32>
    %7 = arith.addf %3, %6 : vector<8x128xf32>
    %c0_6 = arith.constant 0 : index
    %c0_7 = arith.constant 0 : index
    %8 = vector.load %arg6[%c0_6, %c0_7] : memref<8x128xf32, #tpu.memory_space<vmem>>, vector<8x128xf32>
    tpu.vector_store %arg6[%c0_6, %c0_7], %7 {strides = array<i32>} : memref<8x128xf32, #tpu.memory_space<vmem>>, vector<8x128xf32>,
    %c0_i32_8 = arith.constant 0 : i32
    %9 = arith.cmpi eq, %arg2, %c0_i32_8 : i32
    %10 = arith.extui %9 : i1 to i32
    %c0_i32_9 = arith.constant 0 : i32
    %11 = arith.cmpi ne, %10, %c0_i32_9 : i32
    scf.if %11 {
      %c0_10 = arith.constant 0 : index
      %c0_11 = arith.constant 0 : index
      %12 = vector.load %arg6[%c0_10, %c0_11] : memref<8x128xf32, #tpu.memory_space<vmem>>, vector<8x128xf32>
      %c0_12 = arith.constant 0 : index
      %c0_13 = arith.constant 0 : index
      %13 = vector.load %arg5[%c0_12, %c0_13] : memref<1x128xf32, #tpu.memory_space<vmem>>, vector<1x128xf32>
      %14 = vector.broadcast %13 : vector<1x128xf32> to vector<8x128xf32>
      %15 = arith.addf %12, %14 : vector<8x128xf32>
      %cst_14 = arith.constant 0.000000e+00 : f32
      %16 = vector.broadcast %cst_14 : f32 to vector<8x128xf32>
      %17 = arith.maximumf %15, %16 : vector<8x128xf32>
      %c0_15 = arith.constant 0 : index
      %c0_16 = arith.constant 0 : index
      %18 = vector.load %arg6[%c0_15, %c0_16] : memref<8x128xf32, #tpu.memory_space<vmem>>, vector<8x128xf32>
      tpu.vector_store %arg6[%c0_15, %c0_16], %17 {strides = array<i32>} : memref<8x128xf32, #tpu.memory_space<vmem>>, vector<8x128xf32>,
    } else {
    }
    return
  }
  func.func @transform_0(%arg0: i32, %arg1: i32, %arg2: i32) -> (i32, i32) {
    %c0_i32 = arith.constant 0 : i32
    return %arg0, %arg2 : i32, i32
  }
  func.func @transform_1(%arg0: i32, %arg1: i32, %arg2: i32) -> (i32, i32) {
    %c0_i32 = arith.constant 0 : i32
    return %arg2, %arg1 : i32, i32
  }
  func.func @transform_2(%arg0: i32, %arg1: i32, %arg2: i32) -> (i32, i32) {
    %c0_i32 = arith.constant 0 : i32
    %c0_i32_0 = arith.constant 0 : i32
    return %c0_i32, %arg1 : i32, i32
  }
  func.func @transform_3(%arg0: i32, %arg1: i32, %arg2: i32) -> (i32, i32) {
    %c0_i32 = arith.constant 0 : i32
    return %arg0, %arg1 : i32, i32
  }
}

</mosaic_0001>

<bundles_post_ra>
// kernel: _thresholded_linear_impl.1
= control target key start
LH: loop header
LB: loop body
LE: loop exit
PB: predicated region body
PF: predicated region fallthrough
CT: control target
= control target key end

     0   :  { %v228_v1 = vmov 0.0   ;;  %vm229_vm0 = vmmov 0   ;;  %s284_s0 = inlined_call_operand.vmem [shape: bf16[8,128], index: 0, kind: input, shape index: {}]   ;;  %s285_s1 = inlined_call_operand.vmem [shape: bf16[128,128], index: 1, kind: input, shape index: {}]   ;;  %s286_s2 = inlined_call_operand.vmem [shape: f32[1,128], index: 2, kind: input, shape index: {}]   ;;  %s287_s3 = inlined_call_operand.hbm [shape: f32[8,128], index: 3, kind: output, shape index: {}]  }
   0x1   :  { %v198_v0 = vld [vmem:[%s285_s1 + $0x38] sm:$0xff]   ;;  %175 = vmatprep.subr.bf16.mxu0 %v228_v1  ;;  %v199_v2 = vld [vmem:[%s285_s1 + $0x30] sm:$0xff]   ;;  %191 = vmatprep.mubr.msk.bf16.mxu0 %vm229_vm0, %v228_v1  ;;  %v200_v3 = vld [vmem:[%s285_s1 + $0x28] sm:$0xff]  }
   0x2   :  { %176 = vmatpush3.bf16.msra.mxu0 %v198_v0 }
   0x3   :  { %177 = vmatprep.subr.bf16.mxu0 %v228_v1 }
   0x6   :  { %178 = vmatpush3.bf16.msra.mxu0 %v199_v2 }
   0x7   :  { %179 = vmatprep.subr.bf16.mxu0 %v228_v1 }
   0x8   :  { %8 = vsyncpa [#allocation3], 0  ;;  %v201_v4 = vld [vmem:[%s285_s1 + $0x20] sm:$0xff]   ;;  %v202_v5 = vld [vmem:[%s285_s1 + $0x18] sm:$0xff]   ;;  %s230_s5 = smov [#allocation2]  }
   0x9   :  { %v203_v6 = vld [vmem:[%s285_s1 + $0x10] sm:$0xff]   ;;  %v204_v7 = vld [vmem:[%s285_s1 + $0x8] sm:$0xff]   ;;  %v205_v8 = vld [vmem:[%s285_s1] sm:$0xff]   ;;  %s149_s6 = sshll.u32 %s230_s5, 4  ;;  %s150_s6 = int_to_ptr.vmem [resolvable:$true] %s149_s6 }
   0xa   :  { %180 = vmatpush3.bf16.msra.mxu0 %v200_v3  ;;  %v22_v9 = vld [vmem:[%s284_s0] sm:$0xf]  ;;  %s206_s1 = scalar_lea.vmem %s150_s6, 128  ;;  %p211_p1 = scmp.lt.s32.totalorder %s150_s6, %s150_s6 }
   0xb   :  { %181 = vmatprep.subr.bf16.mxu0 %v228_v1  ;;  %v165_v11 = vld [vmem:[%s286_s2] ss:$0 sm:$0xff]  ;;  %p207_p0 = scmp.ne.s32.totalorder %s150_s6, %s206_s1  ;;  %p212_p2 = scmp.lt.s32.totalorder %s206_s1, %s206_s1 }
   0xd   :  { %p213_p3 = por %p212_p2, %p211_p1 }
   0xe   :  { %182 = vmatpush3.bf16.msra.mxu0 %v201_v4 }
   0xf   :  { %183 = vmatprep.subr.bf16.mxu0 %v228_v1  ;;  %p214_p4 = pnand %p213_p3, %p207_p0 }
  0x12   :  { %184 = vmatpush3.bf16.msra.mxu0 %v202_v5 }
  0x13   :  { %185 = vmatprep.subr.bf16.mxu0 %v228_v1 }
  0x16   :  { %186 = vmatpush3.bf16.msra.mxu0 %v203_v6 }
  0x17   :  { %187 = vmatprep.subr.bf16.mxu0 %v228_v1 }
  0x1a   :  { %188 = vmatpush3.bf16.msra.mxu0 %v204_v7 }
  0x1b   :  { %189 = vmatprep.subr.bf16.mxu0 %v228_v1 }
  0x1e   :  { %190 = vmatpush3.bf16.msra.mxu0 %v205_v8 }
  0x21   :  { %192 = vmatmul.mubr.bf16.vlgmr.msra.gmra.mxu0 %v22_v9 }
  0xe1   :  { %v121_v10 = vpop.f32.mrf.mxu0 }
  0xe2   :  { %v140_v13 = vadd.f32 %v165_v11, %v121_v10 }
  0xe3   :  { %v193_v12 = vpop.f32.mrf.mxu0 }
  0xe4   :  { %v141_v15 = vmax.f32 %v140_v13, 0.0 }
  0xe5   :  { %v124_v14 = vpop.f32.mrf.mxu0 }
  0xe6   :  { %142 = vst [vmem:[#allocation2] sm:$0xff] %v141_v15 }
  0xe7   :  { %v194_v16 = vpop.f32.mrf.mxu0 }
  0xe8   :  { %217 = shalt.err (!%p214_p4)
}
  0xe9   :  { %152 = dma.vmem_to_hbm [thread:$0]  %s150_s6, 128, %s287_s3, [#allocation3]  }
  0xea   :  { %226 = dma.done.wait [#allocation3], 128  }
  0xeb   :  { %227 = vsyncadd [#allocation3], 4294967168 }
  0xec   :  { %156 = vsyncpa [#allocation3], 1 }

</bundles_post_ra>
